<compile_context>
chip_gen: v7x
topology: tpu7x:2x2x1
jax: 0.10.0
libtpu: 0.0.40
codegen_flags: <defaults>
</compile_context>

<pallas_src>
import jax
import jax.numpy as jnp
from jax import lax
from jax.experimental import pallas as pl
from jax.experimental.pallas import tpu as pltpu


def _choose_hw_tile(C, HW, itemsize, target_bytes):
    """Lane-axis tile: a multiple of 128, or the full HW extent if it fits."""
    if C * HW * itemsize <= target_bytes or HW <= 128:
        return HW
    tile = (target_bytes // (C * itemsize)) // 128 * 128
    return int(max(128, min(tile, HW)))


def _choose_nb(N, C, hw_tile, itemsize, target_bytes):
    """Batch blocking: largest divisor of N keeping the block <= target."""
    block = C * hw_tile * itemsize
    for d in range(N, 0, -1):
        if N % d == 0 and d * block <= max(block, target_bytes):
            return d
    return 1


def channel_attention(x_nchw, w1, w2, *, target_block_bytes=2 * 1024 * 1024):
    """x_nchw: (N, C, H, W); w1: (C//r, C) = fc1.weight[:,:,0,0]; w2: (C, C//r).

    Returns sigmoid(fc2(relu(fc1(max_pool(x))))) of shape (N, C, 1, 1).
    """
    N, C, H, W = x_nchw.shape
    Cr = w1.shape[0]
    HW = H * W
    itemsize = jnp.dtype(x_nchw.dtype).itemsize
    x2 = x_nchw.reshape(N, C, HW)

    hw_tile = _choose_hw_tile(C, HW, itemsize, target_block_bytes)
    nb = _choose_nb(N, C, hw_tile, itemsize, target_block_bytes)
    n_hw = pl.cdiv(HW, hw_tile)
    mask_tail = (HW % hw_tile) != 0  # static

    # Pre-transposed weights so both contractions and the output are
    # lane-dense (C on the lane axis).  Tiny; stay resident in VMEM.
    w1t = jnp.transpose(w1).astype(jnp.float32)   # (C, Cr)
    w2t = jnp.transpose(w2).astype(jnp.float32)   # (Cr, C)

    def kernel(x_ref, w1t_ref, w2t_ref, o_ref, acc_ref):
        k = pl.program_id(1)

        @pl.when(k == 0)
        def _():
            acc_ref[...] = jnp.full(acc_ref.shape, -jnp.inf, acc_ref.dtype)

        x = x_ref[...]                                       # (nb, C, hw_tile)
        if mask_tail:
            # Last partial tile: out-of-bounds lanes hold undefined data;
            # mask with -inf so they can never win the max.
            lane = lax.broadcasted_iota(jnp.int32, x.shape, 2)
            valid = (k * hw_tile + lane) < HW
            x = jnp.where(valid, x, -jnp.inf)
        tile_max = jnp.max(x, axis=-1, keepdims=True)        # (nb, C, 1)
        acc_ref[...] = jnp.maximum(acc_ref[...], tile_max.astype(jnp.float32))

        # Finalize: fc1 -> relu -> fc2 -> sigmoid on the resident accumulator.
        @pl.when(k == n_hw - 1)
        def _():
            pooled = acc_ref[...][..., 0]                    # (nb, C)
            h = jnp.dot(pooled, w1t_ref[...],
                        preferred_element_type=jnp.float32)  # (nb, Cr)
            h = jnp.maximum(h, 0.0)                          # relu
            y = jnp.dot(h, w2t_ref[...],
                        preferred_element_type=jnp.float32)  # (nb, C)
            o_ref[...] = jax.nn.sigmoid(y)[:, None, :].astype(o_ref.dtype)

    out = pl.pallas_call(
        kernel,
        out_shape=jax.ShapeDtypeStruct((N, 1, C), jnp.float32),
        grid_spec=pltpu.PrefetchScalarGridSpec(
            num_scalar_prefetch=0,
            grid=(N // nb, n_hw),
            in_specs=[
                pl.BlockSpec((nb, C, hw_tile), lambda b, k: (b, 0, k)),
                pl.BlockSpec((C, Cr), lambda b, k: (0, 0)),   # resident weights
                pl.BlockSpec((Cr, C), lambda b, k: (0, 0)),
            ],
            # Same output block across k -> resident; written at the last k.
            out_specs=pl.BlockSpec((nb, 1, C), lambda b, k: (b, 0, 0)),
            scratch_shapes=[pltpu.VMEM((nb, C, 1), jnp.float32)],
        ),
        compiler_params=pltpu.CompilerParams(
            dimension_semantics=("parallel", "arbitrary")),
    )(x2, w1t, w2t)

    return out.reshape(N, C, 1, 1)


def channel_attention_ref(x_nchw, w1, w2):
    # Pure-JAX reference mirroring the PyTorch forward.
    pooled = jnp.max(x_nchw, axis=(2, 3))                    # (N, C)
    h = jnp.maximum(pooled @ w1.T, 0.0)                      # (N, C//r)
    y = h @ w2.T                                             # (N, C)
    return jax.nn.sigmoid(y)[:, :, None, None]               # (N, C, 1, 1)


if __name__ == "__main__":
    # Shapes consistent with the module: ratio=16 -> C must be a multiple of 16.
    N, C, ratio = 2, 64, 16
    Cr = C // ratio

    key = jax.random.PRNGKey(0)
    kx, k1, k2, kx2 = jax.random.split(key, 4)
    w1 = jax.random.normal(k1, (Cr, C), dtype=jnp.float32) * 0.1   # fc1.weight[:, :, 0, 0]
    w2 = jax.random.normal(k2, (C, Cr), dtype=jnp.float32) * 0.1   # fc2.weight[:, :, 0, 0]

    # Case 1: small spatial extent -> single HW tile, batch elements blocked together.
    x = jax.random.normal(kx, (N, C, 16, 16), dtype=jnp.float32)
    out = jax.block_until_ready(channel_attention(x, w1, w2))
    ref = channel_attention_ref(x, w1, w2)
    assert out.shape == (N, C, 1, 1)
    assert jnp.allclose(out, ref, atol=1e-5, rtol=1e-5)

    # Case 2: force the tiled-HW path (multiple k steps + ragged, -inf-masked tail,
    # and per-batch-block finalize).
    xb = jax.random.normal(kx2, (N, C, 16, 10), dtype=jnp.float32)  # HW = 160
    outb = jax.block_until_ready(
        channel_attention(xb, w1, w2, target_block_bytes=32 * 1024))
    refb = channel_attention_ref(xb, w1, w2)
    assert jnp.allclose(outb, refb, atol=1e-5, rtol=1e-5)

    print("KERNEL_OK")
</pallas_src>

<mosaic_0001>
module attributes {stable_mosaic.version = 11 : i64} {
  func.func @kernel(%arg0: i32, %arg1: i32, %arg2: memref<2x64x256xf32, #tpu.memory_space<vmem>>, %arg3: memref<64x4xf32, #tpu.memory_space<vmem>>, %arg4: memref<4x64xf32, #tpu.memory_space<vmem>>, %arg5: memref<2x1x64xf32, #tpu.memory_space<vmem>>, %arg6: memref<2x64x1xf32, #tpu.memory_space<vmem>>) attributes {dimension_semantics = [#tpu.dimension_semantics<parallel>, #tpu.dimension_semantics<arbitrary>], iteration_bounds = array<i64: 1, 1>, scalar_prefetch = 0 : i64, scratch_operands = 1 : i64, tpu.core_type = #tpu.core_type<tc>, window_params = [{transform_indices = @transform_0, window_bounds = array<i64: 2, 64, 256>}, {pipeline_mode = #tpu.pipeline_mode<synchronous>, transform_indices = @transform_1, window_bounds = array<i64: 64, 4>}, {pipeline_mode = #tpu.pipeline_mode<synchronous>, transform_indices = @transform_2, window_bounds = array<i64: 4, 64>}, {transform_indices = @transform_3, window_bounds = array<i64: 2, 1, 64>}]} {
    %c0_i32 = arith.constant 0 : i32
    %0 = arith.cmpi eq, %arg1, %c0_i32 : i32
    %1 = arith.extui %0 : i1 to i32
    %c0_i32_0 = arith.constant 0 : i32
    %2 = arith.cmpi ne, %1, %c0_i32_0 : i32
    scf.if %2 {
      %cst_11 = arith.constant 0xFF800000 : f32
      %12 = vector.broadcast %cst_11 : f32 to vector<2x64x1xf32>
      %c0_12 = arith.constant 0 : index
      %c0_13 = arith.constant 0 : index
      %c0_14 = arith.constant 0 : index
      %13 = vector.load %arg6[%c0_12, %c0_13, %c0_14] : memref<2x64x1xf32, #tpu.memory_space<vmem>>, vector<2x64x1xf32>
      tpu.vector_store %arg6[%c0_12, %c0_13, %c0_14], %12 {strides = array<i32>} : memref<2x64x1xf32, #tpu.memory_space<vmem>>, vector<2x64x1xf32>,
    } else {
    }
    %c0 = arith.constant 0 : index
    %c0_1 = arith.constant 0 : index
    %c0_2 = arith.constant 0 : index
    %3 = vector.load %arg2[%c0, %c0_1, %c0_2] : memref<2x64x256xf32, #tpu.memory_space<vmem>>, vector<2x64x256xf32>
    %cst = arith.constant dense<0xFF800000> : vector<2x64xf32>
    %4 = vector.multi_reduction <maximumf>, %3, %cst [2] : vector<2x64x256xf32> to vector<2x64xf32>
    %5 = vector.shape_cast %4 : vector<2x64xf32> to vector<2x64x1xf32>
    %c0_3 = arith.constant 0 : index
    %c0_4 = arith.constant 0 : index
    %c0_5 = arith.constant 0 : index
    %6 = vector.load %arg6[%c0_3, %c0_4, %c0_5] : memref<2x64x1xf32, #tpu.memory_space<vmem>>, vector<2x64x1xf32>
    %7 = arith.maximumf %6, %5 : vector<2x64x1xf32>
    %c0_6 = arith.constant 0 : index
    %c0_7 = arith.constant 0 : index
    %c0_8 = arith.constant 0 : index
    %8 = vector.load %arg6[%c0_6, %c0_7, %c0_8] : memref<2x64x1xf32, #tpu.memory_space<vmem>>, vector<2x64x1xf32>
    tpu.vector_store %arg6[%c0_6, %c0_7, %c0_8], %7 {strides = array<i32>} : memref<2x64x1xf32, #tpu.memory_space<vmem>>, vector<2x64x1xf32>,
    %c0_i32_9 = arith.constant 0 : i32
    %9 = arith.cmpi eq, %arg1, %c0_i32_9 : i32
    %10 = arith.extui %9 : i1 to i32
    %c0_i32_10 = arith.constant 0 : i32
    %11 = arith.cmpi ne, %10, %c0_i32_10 : i32
    scf.if %11 {
      %c0_11 = arith.constant 0 : index
      %c0_12 = arith.constant 0 : index
      %c0_13 = arith.constant 0 : index
      %12 = vector.load %arg6[%c0_11, %c0_12, %c0_13] : memref<2x64x1xf32, #tpu.memory_space<vmem>>, vector<2x64x1xf32>
      %13 = vector.shape_cast %12 : vector<2x64x1xf32> to vector<2x64xf32>
      %c0_14 = arith.constant 0 : index
      %c0_15 = arith.constant 0 : index
      %14 = vector.load %arg3[%c0_14, %c0_15] : memref<64x4xf32, #tpu.memory_space<vmem>>, vector<64x4xf32>
      %cst_16 = arith.constant dense<0.000000e+00> : vector<2x4xf32>
      %15 = tpu.matmul %13, %14, %cst_16 {dimension_numbers = #tpu.dot_dimension_numbers<[1], [0], [0], [1], [0, 0, 1, 1], [], []>} : vector<2x64xf32>, vector<64x4xf32>, vector<2x4xf32> -> vector<2x4xf32>
      %cst_17 = arith.constant 0.000000e+00 : f32
      %16 = vector.broadcast %cst_17 : f32 to vector<2x4xf32>
      %17 = arith.maximumf %15, %16 : vector<2x4xf32>
      %c0_18 = arith.constant 0 : index
      %c0_19 = arith.constant 0 : index
      %18 = vector.load %arg4[%c0_18, %c0_19] : memref<4x64xf32, #tpu.memory_space<vmem>>, vector<4x64xf32>
      %cst_20 = arith.constant dense<0.000000e+00> : vector<2x64xf32>
      %19 = tpu.matmul %17, %18, %cst_20 {dimension_numbers = #tpu.dot_dimension_numbers<[1], [0], [0], [1], [0, 0, 1, 1], [], []>} : vector<2x4xf32>, vector<4x64xf32>, vector<2x64xf32> -> vector<2x64xf32>
      %20 = arith.negf %19 : vector<2x64xf32>
      %21 = math.exp %20 : vector<2x64xf32>
      %cst_21 = arith.constant 1.000000e+00 : f32
      %22 = vector.broadcast %cst_21 : f32 to vector<2x64xf32>
      %23 = arith.addf %22, %21 : vector<2x64xf32>
      %24 = arith.divf %22, %23 : vector<2x64xf32>
      %25 = vector.shape_cast %24 : vector<2x64xf32> to vector<2x1x64xf32>
      %c0_22 = arith.constant 0 : index
      %c0_23 = arith.constant 0 : index
      %c0_24 = arith.constant 0 : index
      %26 = vector.load %arg5[%c0_22, %c0_23, %c0_24] : memref<2x1x64xf32, #tpu.memory_space<vmem>>, vector<2x1x64xf32>
      tpu.vector_store %arg5[%c0_22, %c0_23, %c0_24], %25 {strides = array<i32>} : memref<2x1x64xf32, #tpu.memory_space<vmem>>, vector<2x1x64xf32>,
    } else {
    }
    return
  }
  func.func @transform_0(%arg0: i32, %arg1: i32) -> (i32, i32, i32) {
    %c0_i32 = arith.constant 0 : i32
    %c0_i32_0 = arith.constant 0 : i32
    return %arg0, %c0_i32, %arg1 : i32, i32, i32
  }
  func.func @transform_1(%arg0: i32, %arg1: i32) -> (i32, i32) {
    %c0_i32 = arith.constant 0 : i32
    %c0_i32_0 = arith.constant 0 : i32
    %c0_i32_1 = arith.constant 0 : i32
    return %c0_i32, %c0_i32_0 : i32, i32
  }
  func.func @transform_2(%arg0: i32, %arg1: i32) -> (i32, i32) {
    %c0_i32 = arith.constant 0 : i32
    %c0_i32_0 = arith.constant 0 : i32
    %c0_i32_1 = arith.constant 0 : i32
    return %c0_i32, %c0_i32_0 : i32, i32
  }
  func.func @transform_3(%arg0: i32, %arg1: i32) -> (i32, i32, i32) {
    %c0_i32 = arith.constant 0 : i32
    %c0_i32_0 = arith.constant 0 : i32
    %c0_i32_1 = arith.constant 0 : i32
    return %arg0, %c0_i32, %c0_i32_0 : i32, i32, i32
  }
}

</mosaic_0001>

<bundles_post_ra>
// kernel: tpu_custom_call.1
= control target key start
LH: loop header
LB: loop body
LE: loop exit
PB: predicated region body
PF: predicated region fallthrough
CT: control target
= control target key end

     0   :  { %8 = vsyncpa [#allocation4], 0  ;;  %s826_s0 = inlined_call_operand.hbm [shape: f32[2,64,256], index: 0, kind: input, shape index: {}]   ;;  %s827_s1 = inlined_call_operand.vmem [shape: f32[64,4], index: 1, kind: input, shape index: {}]   ;;  %s828_s2 = inlined_call_operand.vmem [shape: f32[4,64], index: 2, kind: input, shape index: {}]   ;;  %s829_s3 = inlined_call_operand.hbm [shape: f32[2,1,64], index: 3, kind: output, shape index: {}]  }
   0x1   :  { %9 = vsyncpa [#allocation5], 0  ;;  %s686_s12 = smov [#allocation3]   ;;  %s638_s16 = scalar_lea.hbm %s826_s0, 4096 }
   0x2   :  { %s15_s13 = sshll.u32 %s686_s12, 4  ;;  %p639_p0 = scmp.ne.s32.totalorder %s826_s0, %s638_s16  ;;  %s16_s13 = int_to_ptr.vmem [resolvable:$true] %s15_s13 }
   0x3   :  { %p642_p1 = scmp.lt.u32.totalorder %s638_s16, %s826_s0 }
   0x5   :  { %p644_p2 = pnand %p642_p1, %p639_p0 }
   0x7   :  { %647 = shalt.err (!%p644_p2)
}
   0x8   :  { %s648_s21 = scalar_lea.vmem %s16_s13, 4096  ;;  %p653_p4 = scmp.lt.s32.totalorder %s16_s13, %s16_s13 }
   0x9   :  { %p649_p3 = scmp.ne.s32.totalorder %s16_s13, %s648_s21  ;;  %p654_p5 = scmp.lt.s32.totalorder %s648_s21, %s648_s21 }
   0xb   :  { %p655_p6 = por %p654_p5, %p653_p4 }
   0xd   :  { %p656_p7 = pnand %p655_p6, %p649_p3 }
   0xf   :  { %659 = shalt.err (!%p656_p7)
}
  0x10   :  { %s687_s22 = smov 256   ;;  %s688_s23 = smov 16  }
  0x11   :  { %21 = dma.hbm_to_vmem [thread:$0]  %s826_s0, 4096, %s16_s13, [#allocation4], %s687_s22, %s687_s22, %s688_s23  }
  0x12   :  { %682 = dma.done.wait [#allocation4], 4096  }
  0x13   :  { %683 = vsyncadd [#allocation4], 4294963200  ;;  %vm33_vm0 = vcmask 7168   ;;  %v689_v0 = vmov -inf   ;;  %v66_v1 = vld [vmem:[#allocation3 + $0x80] sm:$0xff]  ;;  %v67_v2 = vld [vmem:[#allocation3 + $0x88] sm:$0xff] }
  0x14   :  { %42 = vst.msk [vmem:[#allocation2 + $0x40] sm:$0xff] %vm33_vm0, %v689_v0  ;;  %34 = vst.msk [vmem:[#allocation2] sm:$0xff] %vm33_vm0, %v689_v0  ;;  %v50_v3 = vld [vmem:[#allocation3] sm:$0xff]  ;;  %v106_v4 = vmax.f32 %v66_v1, %v67_v2  ;;  %v51_v5 = vld [vmem:[#allocation3 + $0x8] sm:$0xff]  ;;  %v690_v48 = vmov 0   ;;  %vm692_vm1 = vmmov 0  }
  0x15   :  { %35 = vst.msk [vmem:[#allocation2 + $0x8] sm:$0xff] %vm33_vm0, %v689_v0  ;;  %36 = vst.msk [vmem:[#allocation2 + $0x10] sm:$0xff] %vm33_vm0, %v689_v0  ;;  %v68_v6 = vld [vmem:[#allocation3 + $0x90] sm:$0xff]  ;;  %v69_v7 = vld [vmem:[#allocation3 + $0x98] sm:$0xff]  ;;  %v82_v8 = vmax.f32 %v50_v3, %v51_v5  ;;  %632 = vset.pattern.permute.xlu0 %v690_v48  ;;  %633 = vset.pattern.permute.xlu1 %v690_v48  ;;  %vm281_vm2 = vcmask 130112   ;;  %vm288_vm3 = vcmask 195712  }
  0x16   :  { %37 = vst.msk [vmem:[#allocation2 + $0x18] sm:$0xff] %vm33_vm0, %v689_v0  ;;  %38 = vst.msk [vmem:[#allocation2 + $0x20] sm:$0xff] %vm33_vm0, %v689_v0  ;;  %v52_v9 = vld [vmem:[#allocation3 + $0x10] sm:$0xff]  ;;  %v53_v10 = vld [vmem:[#allocation3 + $0x18] sm:$0xff]  ;;  %107 = vmax.xlane.f32.xlu1 %v106_v4  ;;  %v109_v11 = vmax.f32 %v68_v6, %v69_v7  ;;  %vm295_vm4 = vcmask 261312   ;;  %vm302_vm5 = vcmask 326912  }
  0x17   :  { %39 = vst.msk [vmem:[#allocation2 + $0x28] sm:$0xff] %vm33_vm0, %v689_v0  ;;  %40 = vst.msk [vmem:[#allocation2 + $0x30] sm:$0xff] %vm33_vm0, %v689_v0  ;;  %83 = vmax.xlane.f32.xlu0 %v82_v8  ;;  %v85_v12 = vmax.f32 %v52_v9, %v53_v10  ;;  %v70_v13 = vld [vmem:[#allocation3 + $0xa0] sm:$0xff]  ;;  %v71_v14 = vld [vmem:[#allocation3 + $0xa8] sm:$0xff]  ;;  %vm309_vm6 = vcmask 392512   ;;  %vm316_vm7 = vcmask 458112  }
  0x18   :  { %41 = vst.msk [vmem:[#allocation2 + $0x38] sm:$0xff] %vm33_vm0, %v689_v0  ;;  %43 = vst.msk [vmem:[#allocation2 + $0x48] sm:$0xff] %vm33_vm0, %v689_v0  ;;  %v54_v15 = vld [vmem:[#allocation3 + $0x20] sm:$0xff]  ;;  %v55_v16 = vld [vmem:[#allocation3 + $0x28] sm:$0xff]  ;;  %v112_v17 = vmax.f32 %v70_v13, %v71_v14  ;;  %vm323_vm8 = vcmask 523712   ;;  %vm364_vm9 = vcmask 1041409  }
  0x19   :  { %44 = vst.msk [vmem:[#allocation2 + $0x50] sm:$0xff] %vm33_vm0, %v689_v0  ;;  %45 = vst.msk [vmem:[#allocation2 + $0x58] sm:$0xff] %vm33_vm0, %v689_v0  ;;  %v72_v18 = vld [vmem:[#allocation3 + $0xb0] sm:$0xff]  ;;  %v73_v19 = vld [vmem:[#allocation3 + $0xb8] sm:$0xff]  ;;  %v88_v20 = vmax.f32 %v54_v15, %v55_v16  ;;  %vm366_vm10 = vcmask 523264   ;;  %vm445_vm11 = vcmask 1043456  }
  0x1a   :  { %46 = vst.msk [vmem:[#allocation2 + $0x60] sm:$0xff] %vm33_vm0, %v689_v0  ;;  %47 = vst.msk [vmem:[#allocation2 + $0x68] sm:$0xff] %vm33_vm0, %v689_v0  ;;  %110 = vmax.xlane.f32.xlu1 %v109_v11  ;;  %v56_v21 = vld [vmem:[#allocation3 + $0x30] sm:$0xff]  ;;  %v57_v22 = vld [vmem:[#allocation3 + $0x38] sm:$0xff]  ;;  %v115_v23 = vmax.f32 %v72_v18, %v73_v19  ;;  %vm441_vm12 = vcmask 31744   ;;  %vm550_vm13 = vcmask 516096  }
  0x1b   :  { %48 = vst.msk [vmem:[#allocation2 + $0x70] sm:$0xff] %vm33_vm0, %v689_v0  ;;  %49 = vst.msk [vmem:[#allocation2 + $0x78] sm:$0xff] %vm33_vm0, %v689_v0  ;;  %86 = vmax.xlane.f32.xlu0 %v85_v12  ;;  %v74_v24 = vld [vmem:[#allocation3 + $0xc0] sm:$0xff]  ;;  %v75_v25 = vld [vmem:[#allocation3 + $0xc8] sm:$0xff]  ;;  %v91_v26 = vmax.f32 %v56_v21, %v57_v22 }
  0x1c   :  { %v58_v27 = vld [vmem:[#allocation3 + $0x40] sm:$0xff]  ;;  %v59_v28 = vld [vmem:[#allocation3 + $0x48] sm:$0xff]  ;;  %v118_v29 = vmax.f32 %v74_v24, %v75_v25  ;;  %v76_v30 = vld [vmem:[#allocation3 + $0xd0] sm:$0xff] }
  0x1d   :  { %v77_v31 = vld [vmem:[#allocation3 + $0xd8] sm:$0xff]  ;;  %v94_v32 = vmax.f32 %v58_v27, %v59_v28  ;;  %v60_v33 = vld [vmem:[#allocation3 + $0x50] sm:$0xff]  ;;  %v78_v36 = vld [vmem:[#allocation3 + $0xe0] sm:$0xff] }
  0x1e   :  { %113 = vmax.xlane.f32.xlu1 %v112_v17  ;;  %v61_v34 = vld [vmem:[#allocation3 + $0x58] sm:$0xff]  ;;  %v121_v35 = vmax.f32 %v76_v30, %v77_v31  ;;  %v79_v37 = vld [vmem:[#allocation3 + $0xe8] sm:$0xff]  ;;  %v62_v39 = vld [vmem:[#allocation3 + $0x60] sm:$0xff] }
  0x1f   :  { %89 = vmax.xlane.f32.xlu0 %v88_v20  ;;  %v97_v38 = vmax.f32 %v60_v33, %v61_v34  ;;  %v63_v40 = vld [vmem:[#allocation3 + $0x68] sm:$0xff]  ;;  %v124_v41 = vmax.f32 %v78_v36, %v79_v37  ;;  %v80_v42 = vld [vmem:[#allocation3 + $0xf0] sm:$0xff]  ;;  %v81_v43 = vld [vmem:[#allocation3 + $0xf8] sm:$0xff] }
  0x20   :  { %v100_v44 = vmax.f32 %v62_v39, %v63_v40  ;;  %v64_v45 = vld [vmem:[#allocation3 + $0x70] sm:$0xff]  ;;  %v65_v46 = vld [vmem:[#allocation3 + $0x78] sm:$0xff]  ;;  %v127_v47 = vmax.f32 %v80_v42, %v81_v43  ;;  %v138_v50 = vld [vmem:[#allocation2 + $0x40] sm:$0xff] }
  0x21   :  { %v103_v49 = vmax.f32 %v64_v45, %v65_v46  ;;  %v130_v51 = vld [vmem:[#allocation2] sm:$0xff]  ;;  %v139_v56 = vld [vmem:[#allocation2 + $0x48] sm:$0xff]  ;;  %v140_v62 = vld [vmem:[#allocation2 + $0x50] sm:$0xff] }
  0x22   :  { %116 = vmax.xlane.f32.xlu1 %v115_v23  ;;  %v131_v57 = vld [vmem:[#allocation2 + $0x8] sm:$0xff]  ;;  %v132_v63 = vld [vmem:[#allocation2 + $0x10] sm:$0xff]  ;;  %v141_v3 = vld [vmem:[#allocation2 + $0x58] sm:$0xff] }
  0x23   :  { %92 = vmax.xlane.f32.xlu0 %v91_v26  ;;  %v133_v6 = vld [vmem:[#allocation2 + $0x18] sm:$0xff]  ;;  %v142_v10 = vld [vmem:[#allocation2 + $0x60] sm:$0xff]  ;;  %v143_v18 = vld [vmem:[#allocation2 + $0x68] sm:$0xff] }
  0x24   :  { %v134_v13 = vld [vmem:[#allocation2 + $0x20] sm:$0xff]  ;;  %v135_v20 = vld [vmem:[#allocation2 + $0x28] sm:$0xff]  ;;  %v144_v25 = vld [vmem:[#allocation2 + $0x70] sm:$0xff] }
  0x25   :  { %v136_v27 = vld [vmem:[#allocation2 + $0x30] sm:$0xff]  ;;  %v145_v33 = vld [vmem:[#allocation2 + $0x78] sm:$0xff]  ;;  %v199_v48 = vld [vmem:[%s827_s1 + $0x8] sm:$0xff] }
  0x26   :  { %119 = vmax.xlane.f32.xlu1 %v118_v29 }
  0x27   :  { %95 = vmax.xlane.f32.xlu0 %v94_v32 }
  0x2a   :  { %122 = vmax.xlane.f32.xlu1 %v121_v35  ;;  %v137_v35 = vld [vmem:[#allocation2 + $0x38] sm:$0xff] }
  0x2b   :  { %98 = vmax.xlane.f32.xlu0 %v97_v38 }
  0x2e   :  { %125 = vmax.xlane.f32.xlu1 %v124_v41 }
  0x2f   :  { %101 = vmax.xlane.f32.xlu0 %v100_v44 }
  0x32   :  { %128 = vmax.xlane.f32.xlu1 %v127_v47  ;;  %v198_v47 = vld [vmem:[%s827_s1] sm:$0xff] }
  0x33   :  { %104 = vmax.xlane.f32.xlu0 %v103_v49  ;;  %v691_v49 = vmov 0.0|0.0  }
  0x34   :  { %609 = vmatprep.subr.bf16.mxu0 %v691_v49 }
  0xa3   :  { %v108_v52 = vpop.xlane.xlu1 %107 }
  0xa4   :  { %v154_v53 = vmax.f32 %v138_v50, %v108_v52  ;;  %v84_v54 = vpop.xlane.xlu0 %83  ;;  %v610_v50 = vpack.c.bf16 %v199_v48, %v198_v47  ;;  %v200_v52 = vld [vmem:[%s827_s1 + $0x10] sm:$0xff] }
  0xa5   :  { %v146_v55 = vmax.f32 %v130_v51, %v84_v54 }
  0xa6   :  { %171 = vst.msk [vmem:[#allocation2 + $0x40] sm:$0xff] %vm33_vm0, %v154_v53  ;;  %611 = vmatpush3.bf16.msra.mxu0 %v610_v50  ;;  %v201_v53 = vld [vmem:[%s827_s1 + $0x18] sm:$0xff] }
  0xa7   :  { %163 = vst.msk [vmem:[#allocation2] sm:$0xff] %vm33_vm0, %v146_v55  ;;  %v111_v58 = vpop.xlane.xlu1 %110  ;;  %612 = vmatprep.subr.bf16.mxu0 %v691_v49  ;;  %v613_v54 = vpack.c.bf16 %v201_v53, %v200_v52 }
  0xa8   :  { %v155_v59 = vmax.f32 %v139_v56, %v111_v58  ;;  %v87_v60 = vpop.xlane.xlu0 %86  ;;  %v202_v56 = vld [vmem:[%s827_s1 + $0x20] sm:$0xff] }
  0xa9   :  { %v147_v61 = vmax.f32 %v131_v57, %v87_v60  ;;  %v203_v57 = vld [vmem:[%s827_s1 + $0x28] sm:$0xff]  ;;  %v204_v60 = vld [vmem:[%s827_s1 + $0x30] sm:$0xff] }
  0xaa   :  { %172 = vst.msk [vmem:[#allocation2 + $0x48] sm:$0xff] %vm33_vm0, %v155_v59  ;;  %614 = vmatpush3.bf16.msra.mxu0 %v613_v54  ;;  %v616_v58 = vpack.c.bf16 %v203_v57, %v202_v56 }
  0xab   :  { %164 = vst.msk [vmem:[#allocation2 + $0x8] sm:$0xff] %vm33_vm0, %v147_v61  ;;  %v114_v0 = vpop.xlane.xlu1 %113  ;;  %615 = vmatprep.subr.bf16.mxu0 %v691_v49  ;;  %v205_v61 = vld [vmem:[%s827_s1 + $0x38] sm:$0xff] }
  0xac   :  { %v156_v1 = vmax.f32 %v140_v62, %v114_v0  ;;  %v90_v2 = vpop.xlane.xlu0 %89  ;;  %v619_v62 = vpack.c.bf16 %v205_v61, %v204_v60 }
  0xad   :  { %v148_v4 = vmax.f32 %v132_v63, %v90_v2  ;;  %v190_v16 = vld [vmem:[#allocation2 + $0x40] sm:$0xff]  ;;  %v693_v63 = vmov 0.0  }
  0xae   :  { %173 = vst.msk [vmem:[#allocation2 + $0x50] sm:$0xff] %vm33_vm0, %v156_v1  ;;  %v182_v5 = vld [vmem:[#allocation2] sm:$0xff]  ;;  %617 = vmatpush3.bf16.msra.mxu0 %v616_v58  ;;  %601 = vmatprep.mubr.msk.f32.mxu0 %vm692_vm1, %v693_v63 }
  0xaf   :  { %223 = vperm.xlu0 %632, %v182_v5   ;;  %v117_v7 = vpop.xlane.xlu1 %116  ;;  %165 = vst.msk [vmem:[#allocation2 + $0x10] sm:$0xff] %vm33_vm0, %v148_v4  ;;  %618 = vmatprep.subr.bf16.mxu0 %v691_v49  ;;  %v270_v4 = vlaneseq }
  0xb0   :  { %v157_v8 = vmax.f32 %v141_v3, %v117_v7  ;;  %v93_v9 = vpop.xlane.xlu0 %92  ;;  %604 = vmatprep.subr.mxu1 %v693_v63  ;;  %606 = vmatprep.mubr.msk.f32.mxu1 %vm692_vm1, %v693_v63 }
  0xb1   :  { %v149_v11 = vmax.f32 %v133_v6, %v93_v9  ;;  %v191_v23 = vld [vmem:[#allocation2 + $0x48] sm:$0xff]  ;;  %v271_v7 = vand.u32 127, %v270_v4 }
  0xb2   :  { %174 = vst.msk [vmem:[#allocation2 + $0x58] sm:$0xff] %vm33_vm0, %v157_v8  ;;  %v183_v12 = vld [vmem:[#allocation2 + $0x8] sm:$0xff]  ;;  %620 = vmatpush3.bf16.msra.mxu0 %v619_v62 }
  0xb3   :  { %226 = vperm.xlu1 %633, %v183_v12   ;;  %v120_v14 = vpop.xlane.xlu1 %119  ;;  %166 = vst.msk [vmem:[#allocation2 + $0x18] sm:$0xff] %vm33_vm0, %v149_v11  ;;  %v276_v8 = vadd.s32 4294967288, %v271_v7  ;;  %v283_v9 = vadd.s32 4294967280, %v271_v7  ;;  %v786_v12 = vshrl.u32 %v270_v4, 7 }
  0xb4   :  { %v158_v15 = vmax.f32 %v142_v10, %v120_v14  ;;  %v96_v17 = vpop.xlane.xlu0 %95  ;;  %v297_v14 = vadd.s32 4294967264, %v271_v7 }
  0xb5   :  { %v150_v19 = vmax.f32 %v134_v13, %v96_v17  ;;  %v192_v38 = vld [vmem:[#allocation2 + $0x50] sm:$0xff]  ;;  %v290_v13 = vadd.s32 4294967272, %v271_v7 }
  0xb6   :  { %175 = vst.msk [vmem:[#allocation2 + $0x60] sm:$0xff] %vm33_vm0, %v158_v15  ;;  %v184_v30 = vld [vmem:[#allocation2 + $0x10] sm:$0xff]  ;;  %v279_v15 = vsub.s32 %v276_v8, %v786_v12 }
  0xb7   :  { %247 = vperm.xlu1 %633, %v190_v16   ;;  %v123_v21 = vpop.xlane.xlu1 %122  ;;  %167 = vst.msk [vmem:[#allocation2 + $0x20] sm:$0xff] %vm33_vm0, %v150_v19  ;;  %v286_v16 = vsub.s32 %v283_v9, %v786_v12 }
  0xb8   :  { %v159_v22 = vmax.f32 %v143_v18, %v123_v21  ;;  %v99_v24 = vpop.xlane.xlu0 %98  ;;  %v274_v18 = vsub.s32 %v271_v7, %v786_v12  ;;  %v300_v21 = vsub.s32 %v297_v14, %v786_v12 }
  0xb9   :  { %v151_v26 = vmax.f32 %v135_v20, %v99_v24  ;;  %v193_v44 = vld [vmem:[#allocation2 + $0x58] sm:$0xff]  ;;  %v293_v20 = vsub.s32 %v290_v13, %v786_v12 }
  0xba   :  { %176 = vst.msk [vmem:[#allocation2 + $0x68] sm:$0xff] %vm33_vm0, %v159_v22  ;;  %v185_v42 = vld [vmem:[#allocation2 + $0x18] sm:$0xff] }
  0xbb   :  { %250 = vperm.xlu1 %633, %v191_v23   ;;  %v126_v28 = vpop.xlane.xlu1 %125  ;;  %168 = vst.msk [vmem:[#allocation2 + $0x28] sm:$0xff] %vm33_vm0, %v151_v26 }
  0xbc   :  { %v160_v29 = vmax.f32 %v144_v25, %v126_v28  ;;  %v102_v31 = vpop.xlane.xlu0 %101  ;;  %v304_v25 = vadd.s32 4294967256, %v271_v7 }
  0xbd   :  { %v194_v32 = vld [vmem:[#allocation2 + $0x60] sm:$0xff]  ;;  %v152_v34 = vmax.f32 %v136_v27, %v102_v31  ;;  %v311_v31 = vadd.s32 4294967248, %v271_v7 }
  0xbe   :  { %177 = vst.msk [vmem:[#allocation2 + $0x70] sm:$0xff] %vm33_vm0, %v160_v29  ;;  %259 = vperm.xlu0 %632, %v194_v32   ;;  %v186_v46 = vld [vmem:[#allocation2 + $0x20] sm:$0xff]  ;;  %v307_v32 = vsub.s32 %v304_v25, %v786_v12 }
  0xbf   :  { %229 = vperm.xlu1 %633, %v184_v30   ;;  %v129_v36 = vpop.xlane.xlu1 %128  ;;  %169 = vst.msk [vmem:[#allocation2 + $0x30] sm:$0xff] %vm33_vm0, %v152_v34 }
  0xc0   :  { %v161_v37 = vmax.f32 %v145_v33, %v129_v36  ;;  %v105_v39 = vpop.xlane.xlu0 %104 }
  0xc1   :  { %v195_v40 = vld [vmem:[#allocation2 + $0x68] sm:$0xff]  ;;  %v153_v41 = vmax.f32 %v137_v35, %v105_v39  ;;  %v318_v35 = vadd.s32 4294967240, %v271_v7  ;;  %v314_v39 = vsub.s32 %v311_v31, %v786_v12 }
  0xc2   :  { %178 = vst.msk [vmem:[#allocation2 + $0x78] sm:$0xff] %vm33_vm0, %v161_v37  ;;  %262 = vperm.xlu0 %632, %v195_v40   ;;  %v187_v51 = vld [vmem:[#allocation2 + $0x28] sm:$0xff] }
  0xc3   :  { %253 = vperm.xlu1 %633, %v192_v38   ;;  %170 = vst.msk [vmem:[#allocation2 + $0x38] sm:$0xff] %vm33_vm0, %v153_v41 }
  0xc5   :  { %v196_v43 = vld [vmem:[#allocation2 + $0x70] sm:$0xff] }
  0xc6   :  { %265 = vperm.xlu0 %632, %v196_v43   ;;  %v188_v55 = vld [vmem:[#allocation2 + $0x30] sm:$0xff] }
  0xc7   :  { %232 = vperm.xlu1 %633, %v185_v42  }
  0xc9   :  { %v197_v45 = vld [vmem:[#allocation2 + $0x78] sm:$0xff] }
  0xca   :  { %268 = vperm.xlu0 %632, %v197_v45   ;;  %v189_v59 = vld [vmem:[#allocation2 + $0x38] sm:$0xff] }
  0xcb   :  { %256 = vperm.xlu1 %633, %v193_v44   ;;  %v321_v44 = vsub.s32 %v318_v35, %v786_v12 }
  0xcf   :  { %235 = vperm.xlu1 %633, %v186_v46  }
  0xd3   :  { %238 = vperm.xlu1 %633, %v187_v51  }
  0xd7   :  { %241 = vperm.xlu1 %633, %v188_v55  }
  0xdb   :  { %244 = vperm.xlu1 %633, %v189_v59  }
 0x12e   :  { %v224_v5 = vpop.permute.xlu0 %223 }
 0x12f   :  { %v275_v41 = vrot.slane %v224_v5, %v274_v18 }
 0x132   :  { %v227_v0 = vpop.permute.xlu1 %226 }
 0x133   :  { %v280_v37 = vrot.slane %v227_v0, %v279_v15 }
 0x135   :  { %v282_v47 = vsel %vm281_vm2, %v280_v37, %v275_v41 }
 0x136   :  { %v248_v1 = vpop.permute.xlu1 %247 }
 0x137   :  { %v328_v24 = vrot.slane %v248_v1, %v274_v18  ;;  %v440_v1 = vld [vmem:[%s828_s2] sm:$0xf]  ;;  %s695_s2 = smov [#allocation6]  }
 0x138   :  { %605 = vmatpush3.msk.msra.mxu1 %vm445_vm11, %v440_v1  ;;  %s558_s15 = sshll.u32 %s695_s2, 4  ;;  %s559_s15 = int_to_ptr.vmem [resolvable:$true] %s558_s15 }
 0x139   :  { %s660_s16 = scalar_lea.vmem %s559_s15, 32  ;;  %p665_p9 = scmp.lt.s32.totalorder %s559_s15, %s559_s15 }
 0x13a   :  { %v251_v2 = vpop.permute.xlu1 %250  ;;  %p661_p8 = scmp.ne.s32.totalorder %s559_s15, %s660_s16  ;;  %p666_p10 = scmp.lt.s32.totalorder %s660_s16, %s660_s16 }
 0x13b   :  { %v332_v19 = vrot.slane %v251_v2, %v279_v15 }
 0x13c   :  { %p667_p11 = por %p666_p10, %p665_p9 }
 0x13d   :  { %v260_v10 = vpop.permute.xlu0 %259  ;;  %v333_v28 = vsel %vm281_vm2, %v332_v19, %v328_v24 }
 0x13e   :  { %v230_v3 = vpop.permute.xlu1 %229  ;;  %v347_v29 = vrot.slane %v260_v10, %v300_v21  ;;  %v694_v10 = vmov 1966171168   ;;  %p668_p12 = pnand %p667_p11, %p661_p8 }
 0x13f   :  { %v287_v38 = vrot.slane %v230_v3, %v286_v16 }
 0x141   :  { %v263_v23 = vpop.permute.xlu0 %262  ;;  %v289_v50 = vsel %vm288_vm3, %v287_v38, %v282_v47 }
 0x142   :  { %v254_v6 = vpop.permute.xlu1 %253  ;;  %v352_v42 = vrot.slane %v263_v23, %v307_v32 }
 0x143   :  { %v337_v22 = vrot.slane %v254_v6, %v286_v16 }
 0x145   :  { %v338_v30 = vsel %vm288_vm3, %v337_v22, %v333_v28  ;;  %v266_v34 = vpop.permute.xlu0 %265 }
 0x146   :  { %v233_v11 = vpop.permute.xlu1 %232  ;;  %v357_v51 = vrot.slane %v266_v34, %v314_v39 }
 0x147   :  { %v294_v43 = vrot.slane %v233_v11, %v293_v20  ;;  %v527_v11 = vunpack.c.l.s4 %v694_v10 }
 0x149   :  { %v269_v52 = vpop.permute.xlu0 %268  ;;  %v296_v54 = vsel %vm295_vm4, %v294_v43, %v289_v50  ;;  %v528_v13 = vunpack.c.0.s8 %v527_v11 }
 0x14a   :  { %v257_v17 = vpop.permute.xlu1 %256  ;;  %v362_v58 = vrot.slane %v269_v52, %v321_v44 }
 0x14b   :  { %v342_v26 = vrot.slane %v257_v17, %v293_v20  ;;  %v531_v14 = vsub.s32 %v528_v13, %v786_v12 }
 0x14d   :  { %v343_v33 = vsel %vm295_vm4, %v342_v26, %v338_v30 }
 0x14e   :  { %v236_v27 = vpop.permute.xlu1 %235  ;;  %v348_v40 = vsel %vm302_vm5, %v347_v29, %v343_v33 }
 0x14f   :  { %v301_v45 = vrot.slane %v236_v27, %v300_v21  ;;  %v353_v48 = vsel %vm309_vm6, %v352_v42, %v348_v40 }
 0x150   :  { %v358_v55 = vsel %vm316_vm7, %v357_v51, %v353_v48 }
 0x151   :  { %v303_v56 = vsel %vm302_vm5, %v301_v45, %v296_v54  ;;  %v363_v62 = vsel %vm323_vm8, %v362_v58, %v358_v55 }
 0x152   :  { %v239_v36 = vpop.permute.xlu1 %238 }
 0x153   :  { %v308_v49 = vrot.slane %v239_v36, %v307_v32 }
 0x155   :  { %v310_v59 = vsel %vm309_vm6, %v308_v49, %v303_v56 }
 0x156   :  { %v242_v46 = vpop.permute.xlu1 %241 }
 0x157   :  { %v315_v53 = vrot.slane %v242_v46, %v314_v39 }
 0x159   :  { %v317_v61 = vsel %vm316_vm7, %v315_v53, %v310_v59 }
 0x15a   :  { %v245_v57 = vpop.permute.xlu1 %244 }
 0x15b   :  { %v322_v60 = vrot.slane %v245_v57, %v321_v44 }
 0x15d   :  { %v324_v63 = vsel %vm323_vm8, %v322_v60, %v317_v61 }
 0x15e   :  { %v365_v0 = vsel %vm364_vm9, %v363_v62, %v324_v63 }
 0x15f   :  { %602 = vmatmul.mubr.msk.f32.vlgmr.msra.gmra.mrb[0].mxu0 %vm366_vm10, %v365_v0 }
 0x232   :  { %v435_v2 = vpop.f32.mrb[0].mxu0 }
 0x233   :  { %v439_v3 = vmax.f32 %v435_v2, 0.0  ;;  %v603_v4 = vpop.f32.mrb[1].mxu0 }
 0x235   :  { %607 = vmatmul.mubr.msk.f32.vlgmr.msra.gmra.mrb[0].mxu1 %vm441_vm12, %v439_v3 }
 0x308   :  { %v515_v5 = vpop.f32.mrb[0].mxu1 }
 0x309   :  { %v573_v6 = vmul.f32 -1.442695, %v515_v5  ;;  %v608_v7 = vpop.f32.mrb[1].mxu1 }
 0x30b   :  { %634 = vpow2.f32 %v573_v6 }
 0x315   :  { %v635_v8 = vpop.eup %634 }
 0x316   :  { %v522_v9 = vadd.f32 1.0, %v635_v8 }
 0x318   :  { %636 = vrcp.f32 %v522_v9 }
 0x322   :  { %v637_v15 = vpop.eup %636 }
 0x323   :  { %v532_v16 = vrot.slane %v637_v15, %v531_v14 }
 0x325   :  { %v533_v17 = vcombine.high %v532_v16, %v532_v16  ;;  %v540_v18 = vrot.slane %v532_v16, %v531_v14 }
 0x327   :  { %v547_v19 = vrot.slane %v533_v17, %v531_v14  ;;  %551 = vst.msk [vmem:[#allocation6] sm:$0x1] %vm550_vm13, %v540_v18 }
 0x329   :  { %552 = vst.msk [vmem:[#allocation6 + $0x1] sm:$0x1] %vm550_vm13, %v547_v19 }
 0x32a   :  { %671 = shalt.err (!%p668_p12)
}
 0x32b   :  { %s672_s19 = scalar_lea.hbm %s829_s3, 32 }
 0x32c   :  { %p673_p13 = scmp.ne.s32.totalorder %s829_s3, %s672_s19  ;;  %p676_p0 = scmp.lt.u32.totalorder %s672_s19, %s829_s3 }
 0x32e   :  { %p678_p1 = pnand %p676_p0, %p673_p13 }
 0x330   :  { %681 = shalt.err (!%p678_p1)
}
 0x331   :  { %s696_s25 = smov 1  }
 0x332   :  { %564 = dma.vmem_to_hbm [thread:$0]  %s559_s15, 32, %s829_s3, [#allocation5], %s688_s23, %s688_s23, %s696_s25  }
 0x333   :  { %684 = dma.done.wait [#allocation5], 32  }
 0x334   :  { %685 = vsyncadd [#allocation5], 4294967264 }
 0x335   :  { %568 = vsyncpa [#allocation4], 1 }
 0x336   :  { %569 = vsyncpa [#allocation5], 1 }

</bundles_post_ra>
